<compile_context>
chip_gen: v5e
topology: v5e:2x2
jax: 0.10.0
libtpu: 0.0.40
codegen_flags: <defaults>
</compile_context>

<pallas_src>
import functools

import numpy as np
import jax
import jax.numpy as jnp
from jax.experimental import pallas as pl
from jax.experimental.pallas import tpu as pltpu

BN_EPS = 1e-5
CONV_CHANNELS = [(3, 32), (32, 64), (64, 128), (128, 256), (256, 256), (256, 256)]
CEIL_MODES = [False, False, True, True, True, True]


# ----------------------------- device / tiling config ------------------------------

def _round_up(x, m):
    return ((x + m - 1) // m) * m


def _device_cfg():
    kind = ""
    try:
        kind = jax.devices()[0].device_kind.lower()
    except Exception:
        pass
    if "v5" in kind or "v6" in kind:  # 128 MiB physical VMEM -> big tiles
        return {"vmem_limit": 100 * 2**20, "tile_budget": 44 * 2**20,
                "weight_budget": 12 * 2**20,
                "row_align": 128 if "v5" in kind else 256, "max_tm": 8192}
    # v7x (64 MiB VMEM) and unknown generations: conservative budgets.
    return {"vmem_limit": 32 * 2**20, "tile_budget": 18 * 2**20,
            "weight_budget": 10 * 2**20, "row_align": 256, "max_tm": 8192}


def _pick_tc(K, Cout, cfg):
    """Output-channel tile: shrink only if the (double-buffered) scattered weight
    block would blow the VMEM budget (layers 5-6)."""
    kp = _round_up(K, 128)
    tc = Cout
    while tc > 128 and 2 * kp * (4 * tc) * 2 > cfg["weight_budget"]:
        tc //= 2
    return tc


def _conv_tiles(M, K, tc, cfg):
    """Row tile for the fused conv kernel with lane-padded VMEM accounting."""
    kp = _round_up(K, 128)            # slab block lane padding (e.g. layer 1: 48 -> 128)
    c4p = _round_up(4 * tc, 128)      # matmul N width (f32 epilogue temporaries)
    cop = _round_up(tc, 128)          # output block lane padding
    per_row = 2 * kp * 2 + 2 * cop * 2 + 3 * c4p * 4   # slab + out (x2 bufs) + f32 temps
    fixed = 2 * kp * c4p * 2 + 4 * cop * 4 + (1 << 19)  # weight (x2 bufs) + scale/shift
    avail = max(cfg["tile_budget"] - fixed, per_row * cfg["row_align"])
    tm = (avail // per_row) // cfg["row_align"] * cfg["row_align"]
    tm = max(cfg["row_align"], min(tm, cfg["max_tm"]))
    m8 = _round_up(M, 8)
    if tm >= m8:
        return m8, m8
    return tm, _round_up(M, tm)


def _pick_tk(K, max_tk=4096):
    tk = (max_tk // 256) * 256
    while tk >= 256:
        if K % tk == 0:
            return tk
        tk -= 256
    return K


# ----------------------------- Pallas kernels ---------------------------------------

def _conv_pool_kernel(slab_ref, w_ref, scale_ref, shift_ref, o_ref):
    """Fused pooled-window conv: one dot produces all 4 conv positions of each 2x2
    pooling window; epilogue = max over positions, BN affine (scale>0), ReLU, bf16."""
    r = jnp.dot(slab_ref[...], w_ref[...], preferred_element_type=jnp.float32)
    tc = o_ref.shape[-1]
    m = jnp.maximum(jnp.maximum(r[:, 0 * tc:1 * tc], r[:, 1 * tc:2 * tc]),
                    jnp.maximum(r[:, 2 * tc:3 * tc], r[:, 3 * tc:4 * tc]))
    y = jnp.maximum(m * scale_ref[...] + shift_ref[...], 0.0)
    o_ref[...] = y.astype(o_ref.dtype)


def _linear1_kernel(x_ref, w_ref, o_ref):
    """K-tiled bias-free Linear + ReLU; accumulates into the resident f32 output block.
    Grid axis 0 (output halves) is parallel so both v7x TensorCores stream weights."""
    @pl.when(pl.program_id(1) == 0)
    def _():
        o_ref[...] = jnp.zeros_like(o_ref)

    o_ref[...] += jnp.dot(x_ref[...], w_ref[...], preferred_element_type=jnp.float32)

    @pl.when(pl.program_id(1) == pl.num_programs(1) - 1)
    def _():
        o_ref[...] = jnp.maximum(o_ref[...], 0.0)


def _head_kernel(x_ref, w2_ref, w3_ref, o_ref):
    """Fused Linear2 + ReLU + Linear3 + Sigmoid (Dropout = identity in eval mode)."""
    h = jnp.dot(x_ref[...].astype(jnp.bfloat16), w2_ref[...],
                preferred_element_type=jnp.float32)
    h = jnp.maximum(h, 0.0).astype(jnp.bfloat16)
    z = jnp.dot(h, w3_ref[...], preferred_element_type=jnp.float32)
    o_ref[...] = 1.0 / (1.0 + jnp.exp(-z))


# ----------------------------- layer wrappers ---------------------------------------

def _make_conv_weight(w, tc):
    """Scatter a (3,3,Cin,Cout) kernel into the (16*Cin, 4*Cout) pooled-window weight.

    Row index = (uy*4 + ux)*Cin + ci over the 4x4 union patch; columns are laid out as
    (n_tile, position, co_in_tile) so an output-channel grid tile of 4*tc columns holds
    all 4 conv positions for its tc channels (contiguous lane slices in the kernel)."""
    cin, cout = w.shape[2], w.shape[3]
    w4 = np.zeros((4, 4, cin, 4, cout), np.float32)
    for ry in range(2):
        for rx in range(2):
            w4[ry:ry + 3, rx:rx + 3, :, ry * 2 + rx, :] = w
    nt = cout // tc
    w4 = w4.reshape(16 * cin, 4, nt, tc).transpose(0, 2, 1, 3).reshape(16 * cin, 4 * cout)
    return w4


def conv_bn_relu_pool(x, w4, scale, shift, tc, ceil_mode, cfg):
    """x: (N,H,W,Cin) bf16; w4: (16*Cin, 4*Cout) bf16.  Returns pooled NHWC bf16."""
    N, H, W, Cin = x.shape
    K = 16 * Cin
    Cout = w4.shape[1] // 4
    n_tiles = Cout // tc
    if ceil_mode and ((H % 2) or (W % 2)):
        # TODO(synk): ceil_mode partial pooling windows (odd H/W) are never hit here.
        raise NotImplementedError("ceil_mode with odd spatial size is not supported")
    Ho = (H + 1) // 2 if ceil_mode else H // 2
    Wo = (W + 1) // 2 if ceil_mode else W // 2

    # Pooled-window patch matrix: for every pooled position, the 4x4 (stride-2) union
    # patch of the zero-padded input.  4x the activation volume (vs 9x for 3x3 im2col).
    xp = jnp.pad(x, ((0, 0), (1, 1), (1, 1), (0, 0)))
    parts = [xp[:, uy:uy + 2 * Ho:2, ux:ux + 2 * Wo:2, :]
             for uy in range(4) for ux in range(4)]
    slab = jnp.concatenate(parts, axis=-1).reshape(N * Ho * Wo, K)

    M = N * Ho * Wo
    tm, Mp = _conv_tiles(M, K, tc, cfg)
    if Mp != M:
        slab = jnp.pad(slab, ((0, Mp - M), (0, 0)))

    out = pl.pallas_call(
        _conv_pool_kernel,
        out_shape=jax.ShapeDtypeStruct((Mp, Cout), jnp.bfloat16),
        grid_spec=pltpu.PrefetchScalarGridSpec(
            num_scalar_prefetch=0,
            grid=(Mp // tm, n_tiles),
            in_specs=[
                pl.BlockSpec((tm, K), lambda i, j: (i, 0)),
                pl.BlockSpec((K, 4 * tc), lambda i, j: (0, j)),
                pl.BlockSpec((1, tc), lambda i, j: (0, j)),
                pl.BlockSpec((1, tc), lambda i, j: (0, j)),
            ],
            out_specs=pl.BlockSpec((tm, tc), lambda i, j: (i, j)),
        ),
        compiler_params=pltpu.CompilerParams(
            dimension_semantics=("parallel", "parallel"),
            vmem_limit_bytes=cfg["vmem_limit"],
        ),
    )(slab, w4, scale.reshape(1, Cout), shift.reshape(1, Cout))
    return out[:M].reshape(N, Ho, Wo, Cout)


def linear_relu_l1(x, w, cfg):
    """x: (B, 34560) bf16, w: (34560, 256) bf16.  Bias-free Linear + ReLU, f32 out."""
    B, K = x.shape
    Cout = w.shape[1]
    tn = 128
    tk = _pick_tk(K)
    return pl.pallas_call(
        _linear1_kernel,
        out_shape=jax.ShapeDtypeStruct((B, Cout), jnp.float32),
        grid_spec=pltpu.PrefetchScalarGridSpec(
            num_scalar_prefetch=0,
            grid=(Cout // tn, K // tk),
            in_specs=[pl.BlockSpec((B, tk), lambda j, k: (0, k)),
                      pl.BlockSpec((tk, tn), lambda j, k: (k, j))],
            out_specs=pl.BlockSpec((B, tn), lambda j, k: (0, j)),
        ),
        compiler_params=pltpu.CompilerParams(
            dimension_semantics=("parallel", "arbitrary"),
            vmem_limit_bytes=cfg["vmem_limit"],
        ),
    )(x, w)


def classifier_head(x, w2, w3, cfg):
    """Fused Linear2+ReLU+Linear3+Sigmoid (all operands fit VMEM; single step)."""
    return pl.pallas_call(
        _head_kernel,
        out_shape=jax.ShapeDtypeStruct((x.shape[0], w3.shape[1]), jnp.float32),
        compiler_params=pltpu.CompilerParams(vmem_limit_bytes=cfg["vmem_limit"]),
    )(x, w2, w3)


# ----------------------------- params & forward -------------------------------------

def init_params(key, cfg):
    params = {"convs": []}
    for cin, cout in CONV_CHANNELS:
        key, kw, kb = jax.random.split(key, 3)
        fan_in = cin * 9
        # kaiming_normal_ on conv weight, default Conv2d bias init
        w = jax.random.normal(kw, (3, 3, cin, cout), jnp.float32) * np.sqrt(2.0 / fan_in)
        bound = 1.0 / np.sqrt(fan_in)
        b = jax.random.uniform(kb, (cout,), jnp.float32, -bound, bound)
        # BatchNorm eval mode with gamma=1, beta=0, running_mean=0, running_var=1,
        # folded with the conv bias:  y = scale*conv + shift.
        scale = jnp.full((cout,), 1.0 / np.sqrt(1.0 + BN_EPS), jnp.float32)
        shift = scale * b
        assert float(jnp.min(scale)) > 0.0  # post-max BN fold in the kernel requires it
        tc = _pick_tc(16 * cin, cout, cfg)
        w4 = jnp.asarray(_make_conv_weight(np.asarray(w), tc), jnp.bfloat16)
        params["convs"].append((w4, scale, shift))

    key, k1, k2, k3 = jax.random.split(key, 4)
    # nn.init.uniform_(-0.1, 0.1), bias=False.  Linear1 rows are permuted from the
    # PyTorch CHW-flatten order to NHWC order so the flatten can stay NHWC.
    w1 = jax.random.uniform(k1, (256 * 9 * 15, 256), jnp.float32, -0.1, 0.1)
    w1 = w1.reshape(256, 9, 15, 256).transpose(1, 2, 0, 3).reshape(256 * 9 * 15, 256)
    params["w1"] = w1.astype(jnp.bfloat16)
    params["w2"] = jax.random.uniform(k2, (256, 256), jnp.float32, -0.1, 0.1).astype(jnp.bfloat16)
    params["w3"] = jax.random.uniform(k3, (256, 6), jnp.float32, -0.1, 0.1).astype(jnp.bfloat16)
    return params


def convnet_forward(params, x_nchw, cfg):
    x = jnp.transpose(x_nchw, (0, 2, 3, 1)).astype(jnp.bfloat16)   # NCHW -> NHWC bf16
    for (w4, scale, shift), (cin, cout), ceil in zip(params["convs"], CONV_CHANNELS,
                                                     CEIL_MODES):
        tc = _pick_tc(16 * cin, cout, cfg)
        x = conv_bn_relu_pool(x, w4, scale, shift, tc, ceil, cfg)
    x = x.reshape(x.shape[0], -1)                 # NHWC flatten (w1 rows pre-permuted)
    x = linear_relu_l1(x, params["w1"], cfg)      # Linear + ReLU   (Dropout = identity)
    return classifier_head(x, params["w2"], params["w3"], cfg)


# ----------------------------- small correctness self-test --------------------------

def _conv_ref(x, w, scale, shift):
    y = jax.lax.conv_general_dilated(x, w, (1, 1), "SAME",
                                     dimension_numbers=("NHWC", "HWIO", "NHWC"),
                                     precision=jax.lax.Precision.HIGHEST)
    y = jnp.maximum(y * scale + shift, 0.0)
    return jax.lax.reduce_window(y, -jnp.inf, jax.lax.max,
                                 (1, 2, 2, 1), (1, 2, 2, 1), "VALID")


def _self_test(cfg):
    key = jax.random.PRNGKey(42)
    # (Cin, Cout, H, W, ceil, tc): covers the K<128 lane-pad path and the multi-N-tile path.
    for cin, cout, h, w, ceil, tc in [(3, 32, 12, 16, False, 32),
                                      (8, 256, 8, 16, True, 128)]:
        key, kx, kw = jax.random.split(key, 3)
        x = jax.random.normal(kx, (1, h, w, cin), jnp.float32).astype(jnp.bfloat16)
        wconv = np.asarray(jax.random.normal(kw, (3, 3, cin, cout), jnp.float32)) * 0.2
        scale = jnp.asarray(np.linspace(0.5, 1.5, cout), jnp.float32)
        shift = jnp.asarray(np.linspace(-0.3, 0.3, cout), jnp.float32)
        w4 = jnp.asarray(_make_conv_weight(wconv, tc), jnp.bfloat16)
        got = conv_bn_relu_pool(x, w4, scale, shift, tc, ceil, cfg)
        ref = _conv_ref(x.astype(jnp.float32),
                        jnp.asarray(wconv, jnp.bfloat16).astype(jnp.float32),
                        scale, shift)
        np.testing.assert_allclose(np.asarray(got, np.float32), np.asarray(ref),
                                   rtol=5e-2, atol=5e-2)


# ----------------------------- main -------------------------------------------------

if __name__ == "__main__":
    cfg = _device_cfg()
    _self_test(cfg)

    key = jax.random.PRNGKey(0)
    pkey, xkey = jax.random.split(key)
    params = init_params(pkey, cfg)

    # Linear(256*9*15, ...) implies a 9x15 feature map after six 2x poolings, i.e. a
    # 576x960 input; batch = 2.
    x = jax.random.normal(xkey, (2, 3, 576, 960), jnp.float32)

    fwd = jax.jit(functools.partial(convnet_forward, cfg=cfg))
    out = jax.block_until_ready(fwd(params, x))

    assert out.shape == (2, 6), out.shape
    assert bool(jnp.all(jnp.isfinite(out)))
    assert bool(jnp.all((out >= 0.0) & (out <= 1.0)))
    print("KERNEL_OK")
</pallas_src>

<mosaic_0001>
module attributes {stable_mosaic.version = 11 : i64} {
  func.func @_conv_pool_kernel(%arg0: i32, %arg1: i32, %arg2: memref<48x48xbf16, #tpu.memory_space<vmem>>, %arg3: memref<48x128xbf16, #tpu.memory_space<vmem>>, %arg4: memref<1x32xf32, #tpu.memory_space<vmem>>, %arg5: memref<1x32xf32, #tpu.memory_space<vmem>>, %arg6: memref<48x32xbf16, #tpu.memory_space<vmem>>) attributes {dimension_semantics = [#tpu.dimension_semantics<parallel>, #tpu.dimension_semantics<parallel>], iteration_bounds = array<i64: 1, 1>, scalar_prefetch = 0 : i64, scratch_operands = 0 : i64, tpu.core_type = #tpu.core_type<tc>, window_params = [{transform_indices = @transform_0, window_bounds = array<i64: 48, 48>}, {transform_indices = @transform_1, window_bounds = array<i64: 48, 128>}, {transform_indices = @transform_2, window_bounds = array<i64: 1, 32>}, {transform_indices = @transform_3, window_bounds = array<i64: 1, 32>}, {transform_indices = @transform_4, window_bounds = array<i64: 48, 32>}]} {
    %c0 = arith.constant 0 : index
    %c0_0 = arith.constant 0 : index
    %0 = vector.load %arg2[%c0, %c0_0] : memref<48x48xbf16, #tpu.memory_space<vmem>>, vector<48x48xbf16>
    %c0_1 = arith.constant 0 : index
    %c0_2 = arith.constant 0 : index
    %1 = vector.load %arg3[%c0_1, %c0_2] : memref<48x128xbf16, #tpu.memory_space<vmem>>, vector<48x128xbf16>
    %cst = arith.constant dense<0.000000e+00> : vector<48x128xf32>
    %2 = tpu.matmul %0, %1, %cst {dimension_numbers = #tpu.dot_dimension_numbers<[1], [0], [0], [1], [0, 0, 1, 1], [], []>} : vector<48x48xbf16>, vector<48x128xbf16>, vector<48x128xf32> -> vector<48x128xf32>
    %3 = vector.extract_strided_slice %2 {offsets = [0, 0], sizes = [48, 32], strides = [1, 1]} : vector<48x128xf32> to vector<48x32xf32>
    %4 = vector.extract_strided_slice %2 {offsets = [0, 32], sizes = [48, 32], strides = [1, 1]} : vector<48x128xf32> to vector<48x32xf32>
    %5 = arith.maximumf %3, %4 : vector<48x32xf32>
    %6 = vector.extract_strided_slice %2 {offsets = [0, 64], sizes = [48, 32], strides = [1, 1]} : vector<48x128xf32> to vector<48x32xf32>
    %7 = vector.extract_strided_slice %2 {offsets = [0, 96], sizes = [48, 32], strides = [1, 1]} : vector<48x128xf32> to vector<48x32xf32>
    %8 = arith.maximumf %6, %7 : vector<48x32xf32>
    %9 = arith.maximumf %5, %8 : vector<48x32xf32>
    %c0_3 = arith.constant 0 : index
    %c0_4 = arith.constant 0 : index
    %10 = vector.load %arg4[%c0_3, %c0_4] : memref<1x32xf32, #tpu.memory_space<vmem>>, vector<1x32xf32>
    %11 = vector.broadcast %10 : vector<1x32xf32> to vector<48x32xf32>
    %12 = arith.mulf %9, %11 : vector<48x32xf32>
    %c0_5 = arith.constant 0 : index
    %c0_6 = arith.constant 0 : index
    %13 = vector.load %arg5[%c0_5, %c0_6] : memref<1x32xf32, #tpu.memory_space<vmem>>, vector<1x32xf32>
    %14 = vector.broadcast %13 : vector<1x32xf32> to vector<48x32xf32>
    %15 = arith.addf %12, %14 : vector<48x32xf32>
    %cst_7 = arith.constant 0.000000e+00 : f32
    %16 = vector.broadcast %cst_7 : f32 to vector<48x32xf32>
    %17 = arith.maximumf %15, %16 : vector<48x32xf32>
    %18 = arith.truncf %17 : vector<48x32xf32> to vector<48x32xbf16>
    %c0_8 = arith.constant 0 : index
    %c0_9 = arith.constant 0 : index
    %19 = vector.load %arg6[%c0_8, %c0_9] : memref<48x32xbf16, #tpu.memory_space<vmem>>, vector<48x32xbf16>
    tpu.vector_store %arg6[%c0_8, %c0_9], %18 {strides = array<i32>} : memref<48x32xbf16, #tpu.memory_space<vmem>>, vector<48x32xbf16>,
    return
  }
  func.func @transform_0(%arg0: i32, %arg1: i32) -> (i32, i32) {
    %c0_i32 = arith.constant 0 : i32
    %c0_i32_0 = arith.constant 0 : i32
    return %arg0, %c0_i32 : i32, i32
  }
  func.func @transform_1(%arg0: i32, %arg1: i32) -> (i32, i32) {
    %c0_i32 = arith.constant 0 : i32
    %c0_i32_0 = arith.constant 0 : i32
    return %c0_i32, %arg1 : i32, i32
  }
  func.func @transform_2(%arg0: i32, %arg1: i32) -> (i32, i32) {
    %c0_i32 = arith.constant 0 : i32
    %c0_i32_0 = arith.constant 0 : i32
    return %c0_i32, %arg1 : i32, i32
  }
  func.func @transform_3(%arg0: i32, %arg1: i32) -> (i32, i32) {
    %c0_i32 = arith.constant 0 : i32
    %c0_i32_0 = arith.constant 0 : i32
    return %c0_i32, %arg1 : i32, i32
  }
  func.func @transform_4(%arg0: i32, %arg1: i32) -> (i32, i32) {
    %c0_i32 = arith.constant 0 : i32
    return %arg0, %arg1 : i32, i32
  }
}

</mosaic_0001>

<bundles_post_ra>
// kernel: tpu_custom_call.1
= control target key start
LH: loop header
LB: loop body
LE: loop exit
PB: predicated region body
PF: predicated region fallthrough
CT: control target
= control target key end

     0   :  { %9 = vsyncpa [#allocation3], 0  ;;  %s408_s0 = inlined_call_operand.hbm [shape: bf16[48,48], index: 0, kind: input, shape index: {}]   ;;  %s409_s1 = inlined_call_operand.hbm [shape: bf16[48,128], index: 1, kind: input, shape index: {}]   ;;  %s410_s2 = inlined_call_operand.vmem [shape: f32[1,32], index: 2, kind: input, shape index: {}]   ;;  %s411_s3 = inlined_call_operand.vmem [shape: f32[1,32], index: 3, kind: input, shape index: {}]   ;;  %s412_s4 = inlined_call_operand.vmem [shape: bf16[48,32], index: 4, kind: output, shape index: {}]  }
   0x1   :  { %s15_s17 = sshll.u32 %s408_s0, 4  ;;  %s16_s17 = int_to_ptr.hbm [resolvable:$true] %s15_s17 }
   0x2   :  { %10 = vsyncpa [#allocation5], 0  ;;  %s332_s18 = smov [#allocation2]   ;;  %s28_s22 = sshll.u32 %s409_s1, 4  ;;  %s29_s22 = int_to_ptr.hbm [resolvable:$true] %s28_s22 }
   0x3   :  { %s17_s19 = sshll.u32 %s332_s18, 4  ;;  %s333_s23 = smov 64   ;;  %s18_s19 = int_to_ptr.vmem [resolvable:$true] %s17_s19 }
   0x4   :  { %s334_s24 = smov 4   ;;  %s335_s25 = smov [#allocation4]  }
   0x5   :  { %23 = dma.hbm_to_vmem [thread:$0]  %s16_s17, 384, %s18_s19, [#allocation3], %s333_s23, %s333_s23, %s334_s24  }
   0x6   :  { %s30_s26 = sshll.u32 %s335_s25, 4  ;;  %s31_s26 = int_to_ptr.vmem [resolvable:$true] %s30_s26 }
   0x7   :  { %36 = dma.hbm_to_vmem [thread:$0]  %s29_s22, 384, %s31_s26, [#allocation5], %s333_s23, %s333_s23, %s334_s24  }
   0x8   :  { %328 = dma.done.wait [#allocation3], 384  }
   0x9   :  { %329 = vsyncadd [#allocation3], 4294966912 }
   0xa   :  { %330 = dma.done.wait [#allocation5], 384  }
   0xb   :  { %331 = vsyncadd [#allocation5], 4294966912  ;;  %v266_v0 = vld [vmem:[#allocation4 + $0x10] sm:$0xff]  ;;  %v265_v1 = vld [vmem:[#allocation4 + $0x8] sm:$0xff]  ;;  %vm95_vm0 = vcmask 392192   ;;  %s336_s0 = smov 96  }
   0xc   :  { %110 = vmatpush.bf16.msra.mxu0 %v266_v0  ;;  %267 = vmatpush.bf16.msra.mxu1 %v266_v0  ;;  %v264_v2 = vld [vmem:[#allocation4] sm:$0xff]  ;;  %v261_v3 = vld [vmem:[#allocation2] sm:$0xff]  ;;  %v262_v4 = vld [vmem:[#allocation2 + $0x8] sm:$0xff]  ;;  %vm221_vm1 = vcmask 257024  }
   0xd   :  { %268 = vmatpush.bf16.msra.mxu2 %v266_v0  ;;  %v263_v5 = vld [vmem:[#allocation2 + $0x10] sm:$0xff]  ;;  %v278_v24 = vld [vmem:[%s410_s2] ss:$0 sm:$0xff] }
   0xe   :  { %v279_v26 = vld [vmem:[%s411_s3] ss:$0 sm:$0xff] }
  0x10   :  { %111 = vmatpush.bf16.msra.mxu0 %v265_v1  ;;  %269 = vmatpush.bf16.msra.mxu1 %v265_v1 }
  0x11   :  { %270 = vmatpush.bf16.msra.mxu2 %v265_v1 }
  0x14   :  { %112 = vmatpush.bf16.msra.mxu0 %v264_v2  ;;  %271 = vmatpush.bf16.msra.mxu1 %v264_v2 }
  0x15   :  { %272 = vmatpush.bf16.msra.mxu2 %v264_v2 }
  0x17   :  { %258 = vmatmul.msk.bf16.vlgmr.msra.gmra.mxu0 %vm95_vm0, %v261_v3  ;;  %259 = vmatmul.msk.bf16.vlgmr.msra.gmra.mxu1 %vm95_vm0, %v262_v4 }
  0x18   :  { %260 = vmatmul.msk.bf16.vlgmr.msra.gmra.mxu2 %vm95_vm0, %v263_v5 }
  0x94   :  { %v114_v6 = vpop.f32.mrf.mxu0  ;;  %v119_v7 = vpop.f32.mrf.mxu1 }
  0x95   :  { %139 = vrot.lane.b32.xlu1 %v119_v7, %s336_s0  ;;  %135 = vrot.lane.b32.xlu0 %v114_v6, %s336_s0 }
  0x9b   :  { %v124_v8 = vpop.f32.mrf.mxu2 }
  0x9c   :  { %143 = vrot.lane.b32.xlu2 %v124_v8, %s336_s0  ;;  %v116_v9 = vpop.f32.mrf.mxu0  ;;  %v121_v10 = vpop.f32.mrf.mxu1 }
  0x9d   :  { %141 = vrot.lane.b32.xlu1 %v121_v10, %s336_s0  ;;  %137 = vrot.lane.b32.xlu0 %v116_v9, %s336_s0 }
  0xa3   :  { %v126_v11 = vpop.f32.mrf.mxu2 }
  0xa4   :  { %145 = vrot.lane.b32.xlu2 %v126_v11, %s336_s0 }
  0xf6   :  { %v144_v12 = vpop.permute.xlu2 %143 }
  0xf7   :  { %v157_v23 = vmax.f32 %v124_v8, %v144_v12 }
  0xfe   :  { %v146_v17 = vpop.permute.xlu2 %145 }
  0xff   :  { %v158_v20 = vmax.f32 %v126_v11, %v146_v17 }
 0x107   :  { %v140_v13 = vpop.permute.xlu1 %139  ;;  %v136_v14 = vpop.permute.xlu0 %135 }
 0x108   :  { %v155_v15 = vmax.f32 %v119_v7, %v140_v13  ;;  %v153_v16 = vmax.f32 %v114_v6, %v136_v14 }
 0x10a   :  { %169 = vrot.lane.b32.xlu2 %v155_v15, %s333_s23  ;;  %165 = vrot.lane.b32.xlu0 %v153_v16, %s333_s23 }
 0x10f   :  { %v142_v18 = vpop.permute.xlu1 %141  ;;  %v138_v19 = vpop.permute.xlu0 %137 }
 0x110   :  { %v156_v21 = vmax.f32 %v121_v10, %v142_v18  ;;  %v154_v22 = vmax.f32 %v116_v9, %v138_v19 }
 0x112   :  { %175 = vrot.lane.b32.xlu2 %v158_v20, %s333_s23  ;;  %171 = vrot.lane.b32.xlu0 %v156_v21, %s333_s23 }
 0x113   :  { %167 = vrot.lane.b32.xlu1 %v154_v22, %s333_s23 }
 0x11b   :  { %173 = vrot.lane.b32.xlu1 %v157_v23, %s333_s23 }
 0x164   :  { %v170_v25 = vpop.permute.xlu2 %169 }
 0x165   :  { %v185_v27 = vmax.f32 %v155_v15, %v170_v25 }
 0x167   :  { %v195_v28 = vmul.f32 %v278_v24, %v185_v27 }
 0x169   :  { %v205_v29 = vadd.f32 %v279_v26, %v195_v28 }
 0x16b   :  { %v211_v30 = vmax.f32 %v205_v29, 0.0 }
 0x16c   :  { %v176_v31 = vpop.permute.xlu2 %175 }
 0x16d   :  { %v217_v32 = vpack.c.bf16 %v211_v30, %v211_v30  ;;  %v188_v33 = vmax.f32 %v158_v20, %v176_v31 }
 0x16f   :  { %224 = vst.msk [vmem:[%s412_s4 + $0x8] sm:$0xf] %vm221_vm1, %v217_v32  ;;  %v198_v34 = vmul.f32 %v278_v24, %v188_v33 }
 0x171   :  { %v208_v35 = vadd.f32 %v279_v26, %v198_v34 }
 0x173   :  { %v214_v36 = vmax.f32 %v208_v35, 0.0 }
 0x175   :  { %v220_v37 = vpack.c.bf16 %v214_v36, %v214_v36 }
 0x177   :  { %227 = vst.msk [vmem:[%s412_s4 + $0x14] sm:$0xf] %vm221_vm1, %v220_v37 }
 0x17c   :  { %v166_v38 = vpop.permute.xlu0 %165 }
 0x17d   :  { %v183_v39 = vmax.f32 %v153_v16, %v166_v38 }
 0x17f   :  { %v193_v40 = vmul.f32 %v278_v24, %v183_v39 }
 0x181   :  { %v203_v41 = vadd.f32 %v279_v26, %v193_v40 }
 0x183   :  { %v209_v42 = vmax.f32 %v203_v41, 0.0 }
 0x184   :  { %v172_v43 = vpop.permute.xlu0 %171 }
 0x185   :  { %v215_v44 = vpack.c.bf16 %v209_v42, %v209_v42  ;;  %v168_v45 = vpop.permute.xlu1 %167  ;;  %v186_v46 = vmax.f32 %v156_v21, %v172_v43 }
 0x186   :  { %v184_v47 = vmax.f32 %v154_v22, %v168_v45 }
 0x187   :  { %222 = vst.msk [vmem:[%s412_s4] sm:$0xf] %vm221_vm1, %v215_v44  ;;  %v196_v48 = vmul.f32 %v278_v24, %v186_v46 }
 0x188   :  { %v194_v49 = vmul.f32 %v278_v24, %v184_v47 }
 0x189   :  { %v206_v50 = vadd.f32 %v279_v26, %v196_v48 }
 0x18a   :  { %v204_v51 = vadd.f32 %v279_v26, %v194_v49 }
 0x18b   :  { %v212_v52 = vmax.f32 %v206_v50, 0.0 }
 0x18c   :  { %v210_v53 = vmax.f32 %v204_v51, 0.0 }
 0x18d   :  { %v218_v54 = vpack.c.bf16 %v212_v52, %v212_v52  ;;  %v174_v55 = vpop.permute.xlu1 %173 }
 0x18e   :  { %v216_v56 = vpack.c.bf16 %v210_v53, %v210_v53  ;;  %v187_v57 = vmax.f32 %v157_v23, %v174_v55 }
 0x18f   :  { %225 = vst.msk [vmem:[%s412_s4 + $0xc] sm:$0xf] %vm221_vm1, %v218_v54 }
 0x190   :  { %223 = vst.msk [vmem:[%s412_s4 + $0x4] sm:$0xf] %vm221_vm1, %v216_v56  ;;  %v197_v58 = vmul.f32 %v278_v24, %v187_v57 }
 0x192   :  { %v207_v59 = vadd.f32 %v279_v26, %v197_v58 }
 0x194   :  { %v213_v60 = vmax.f32 %v207_v59, 0.0 }
 0x196   :  { %v219_v61 = vpack.c.bf16 %v213_v60, %v213_v60 }
 0x198   :  { %226 = vst.msk [vmem:[%s412_s4 + $0x10] sm:$0xf] %vm221_vm1, %v219_v61 }
 0x199   :  { %232 = vsyncpa [#allocation3], 1 }
 0x19a   :  { %233 = vsyncpa [#allocation5], 1 }

</bundles_post_ra>
